<compile_context>
chip_gen: v7x
topology: tpu7x:2x2x1
jax: 0.10.0
libtpu: 0.0.40
codegen_flags: <defaults>
</compile_context>

<pallas_src>
import jax
import jax.numpy as jnp
from jax.experimental import pallas as pl
from jax.experimental.pallas import tpu as pltpu


_IN, _MID, _OUT = 3, 5, 2
# Folded-parameter layout (SMEM f32[8]): w[0,0] w[0,1] w[1,0] w[1,1] w[2,0] w[2,1] b[0] b[1]
_N_FOLDED = _IN * _OUT + _OUT


def _mlp_kernel(p_ref, x_ref, o_ref):
    """p_ref: SMEM f32[8] folded affine; x_ref: VMEM [3, R, 128]; o_ref: VMEM [2, R, 128]."""
    xs = [x_ref[k] for k in range(_IN)]          # three dense [R, 128] slabs
    for m in range(_OUT):
        acc = p_ref[_IN * _OUT + m]              # bias initializes the accumulator
        for k in range(_IN):
            acc = acc + p_ref[k * _OUT + m] * xs[k]
        # sigmoid(z) == 0.5 * (tanh(0.5 * z) + 1): single EUP push, no f32 divide.
        o_ref[m] = 0.5 * (jnp.tanh(0.5 * acc) + 1.0)


def _round_up(n, m):
    return ((n + m - 1) // m) * m


def _choose_rows_per_tile(nrows, r_max=1024):
    """Rows-of-128 per grid step. Multiple of 8 (sublane), capped so VMEM stays
    small, and kept <= ~half the rows so the grid has >=2 steps (v7x megacore)."""
    if nrows <= 8:
        return 8
    half = _round_up((nrows + 1) // 2, 8)
    return min(r_max, half)


def fully_connected_forward_feature_major(xt, folded_params):
    """Feature-major entry (no wrapper transposes). xt: [3, B] f32 -> [2, B] f32."""
    assert xt.shape[0] == _IN
    B = xt.shape[1]
    nrows = (max(B, 1) + 127) // 128
    R = _choose_rows_per_tile(nrows)
    nrows_p = _round_up(nrows, R)
    Bp = nrows_p * 128

    if Bp != B:
        xt = jnp.pad(xt, ((0, 0), (0, Bp - B)))   # zero-pad batch lanes
    # Free row-major metadata reshape: [3, Bp] -> [3, Bp/128, 128].
    xr = xt.reshape(_IN, nrows_p, 128)

    grid = (nrows_p // R,)
    out = pl.pallas_call(
        _mlp_kernel,
        out_shape=jax.ShapeDtypeStruct((_OUT, nrows_p, 128), jnp.float32),
        grid_spec=pltpu.PrefetchScalarGridSpec(
            num_scalar_prefetch=0,
            grid=grid,
            in_specs=[
                # Folded params: one tiny SMEM slab, read as scalars.
                pl.BlockSpec(memory_space=pltpu.MemorySpace.SMEM),
                # x tile: full feature extent, R rows of 128 lanes (all-dense vregs).
                pl.BlockSpec((_IN, R, 128), lambda i: (0, i, 0)),
            ],
            out_specs=pl.BlockSpec((_OUT, R, 128), lambda i: (0, i, 0)),
        ),
        compiler_params=pltpu.CompilerParams(
            dimension_semantics=("parallel",),     # batch tiles split across TCs on v7x
        ),
    )(folded_params, xr)

    return out.reshape(_OUT, Bp)[:, :B]


def fully_connected_forward(x, folded_params):
    """Module-compatible contract: x [B, 3] f32 -> [B, 2] f32.

    The transposes are wrapper-side layout plumbing (extra HBM passes); prefer
    the feature-major entry point when the producer/consumer can cooperate.
    """
    return fully_connected_forward_feature_major(x.T, folded_params).T


def init_params(key):
    """PyTorch Linear default init: uniform(-1/sqrt(fan_in), 1/sqrt(fan_in))."""
    k1, k2, k3, k4 = jax.random.split(key, 4)
    bound1 = 1.0 / jnp.sqrt(jnp.float32(_IN))
    bound2 = 1.0 / jnp.sqrt(jnp.float32(_MID))
    w1 = jax.random.uniform(k1, (_IN, _MID), jnp.float32, -bound1, bound1)
    b1 = jax.random.uniform(k2, (_MID,), jnp.float32, -bound1, bound1)
    w2 = jax.random.uniform(k3, (_MID, _OUT), jnp.float32, -bound2, bound2)
    b2 = jax.random.uniform(k4, (_MID // _MID * _OUT,), jnp.float32, -bound2, bound2)
    return w1, b1, w2, b2


def fold_params(w1, b1, w2, b2):
    """Fold the two Linears into one affine: W = W1@W2 [3,2], b = b1@W2 + b2 [2]."""
    w = w1.astype(jnp.float32) @ w2.astype(jnp.float32)                    # [3, 2]
    b = b1.astype(jnp.float32) @ w2.astype(jnp.float32) + b2.astype(jnp.float32)
    return jnp.concatenate([w.reshape(-1), b.reshape(-1)]).astype(jnp.float32)


def reference_forward(x, w1, b1, w2, b2):
    h = x @ w1 + b1
    y = h @ w2 + b2
    return jax.nn.sigmoid(y)


if __name__ == "__main__":
    key = jax.random.PRNGKey(0)
    kx, kx2, kp = jax.random.split(key, 3)

    w1, b1, w2, b2 = init_params(kp)
    params = fold_params(w1, b1, w2, b2)

    fwd = jax.jit(fully_connected_forward)
    fwd_fm = jax.jit(fully_connected_forward_feature_major)

    # Small batch consistent with the module's tiny feature sizes.
    B = 8
    x = jax.random.normal(kx, (B, _IN), dtype=jnp.float32)
    out = jax.block_until_ready(fwd(x, params))
    ref = reference_forward(x, w1, b1, w2, b2)
    assert out.shape == (B, _OUT)
    assert jnp.allclose(out, ref, atol=2e-5, rtol=1e-5)

    # Batch not a multiple of 128 -> exercises padding + multi-row tile path.
    B2 = 300
    x2 = jax.random.normal(kx2, (B2, _IN), dtype=jnp.float32)
    out2 = jax.block_until_ready(fwd(x2, params))
    ref2 = reference_forward(x2, w1, b1, w2, b2)
    assert out2.shape == (B2, _OUT)
    assert jnp.allclose(out2, ref2, atol=2e-5, rtol=1e-5)

    # Feature-major (zero-layout-pass) entry point.
    out2_fm = jax.block_until_ready(fwd_fm(x2.T, params))
    assert out2_fm.shape == (_OUT, B2)
    assert jnp.allclose(out2_fm.T, ref2, atol=2e-5, rtol=1e-5)

    print("KERNEL_OK")
</pallas_src>

<mosaic_0001>
module attributes {stable_mosaic.version = 11 : i64} {
  func.func @_mlp_kernel(%arg0: i32, %arg1: memref<8xf32, #tpu.memory_space<smem>>, %arg2: memref<3x8x128xf32, #tpu.memory_space<vmem>>, %arg3: memref<2x8x128xf32, #tpu.memory_space<vmem>>) attributes {dimension_semantics = [#tpu.dimension_semantics<parallel>], iteration_bounds = array<i64: 1>, scalar_prefetch = 0 : i64, scratch_operands = 0 : i64, tpu.core_type = #tpu.core_type<tc>, window_params = [{transform_indices = @transform_0, window_bounds = array<i64: 8>}, {transform_indices = @transform_1, window_bounds = array<i64: 3, 8, 128>}, {transform_indices = @transform_2, window_bounds = array<i64: 2, 8, 128>}]} {
    %c0 = arith.constant 0 : index
    %c0_0 = arith.constant 0 : index
    %c0_1 = arith.constant 0 : index
    %0 = vector.load %arg2[%c0, %c0_0, %c0_1] : memref<3x8x128xf32, #tpu.memory_space<vmem>>, vector<1x8x128xf32>
    %1 = vector.shape_cast %0 : vector<1x8x128xf32> to vector<8x128xf32>
    %c1 = arith.constant 1 : index
    %c0_2 = arith.constant 0 : index
    %c0_3 = arith.constant 0 : index
    %2 = vector.load %arg2[%c1, %c0_2, %c0_3] : memref<3x8x128xf32, #tpu.memory_space<vmem>>, vector<1x8x128xf32>
    %3 = vector.shape_cast %2 : vector<1x8x128xf32> to vector<8x128xf32>
    %c2 = arith.constant 2 : index
    %c0_4 = arith.constant 0 : index
    %c0_5 = arith.constant 0 : index
    %4 = vector.load %arg2[%c2, %c0_4, %c0_5] : memref<3x8x128xf32, #tpu.memory_space<vmem>>, vector<1x8x128xf32>
    %5 = vector.shape_cast %4 : vector<1x8x128xf32> to vector<8x128xf32>
    %c6 = arith.constant 6 : index
    %6 = memref.load %arg1[%c6] : memref<8xf32, #tpu.memory_space<smem>>
    %c0_6 = arith.constant 0 : index
    %7 = memref.load %arg1[%c0_6] : memref<8xf32, #tpu.memory_space<smem>>
    %8 = vector.broadcast %7 : f32 to vector<8x128xf32>
    %9 = arith.mulf %8, %1 : vector<8x128xf32>
    %10 = vector.broadcast %6 : f32 to vector<8x128xf32>
    %11 = arith.addf %10, %9 : vector<8x128xf32>
    %c2_7 = arith.constant 2 : index
    %12 = memref.load %arg1[%c2_7] : memref<8xf32, #tpu.memory_space<smem>>
    %13 = vector.broadcast %12 : f32 to vector<8x128xf32>
    %14 = arith.mulf %13, %3 : vector<8x128xf32>
    %15 = arith.addf %11, %14 : vector<8x128xf32>
    %c4 = arith.constant 4 : index
    %16 = memref.load %arg1[%c4] : memref<8xf32, #tpu.memory_space<smem>>
    %17 = vector.broadcast %16 : f32 to vector<8x128xf32>
    %18 = arith.mulf %17, %5 : vector<8x128xf32>
    %19 = arith.addf %15, %18 : vector<8x128xf32>
    %cst = arith.constant 5.000000e-01 : f32
    %20 = vector.broadcast %cst : f32 to vector<8x128xf32>
    %21 = arith.mulf %20, %19 : vector<8x128xf32>
    %22 = math.tanh %21 : vector<8x128xf32>
    %cst_8 = arith.constant 1.000000e+00 : f32
    %23 = vector.broadcast %cst_8 : f32 to vector<8x128xf32>
    %24 = arith.addf %22, %23 : vector<8x128xf32>
    %cst_9 = arith.constant 5.000000e-01 : f32
    %25 = vector.broadcast %cst_9 : f32 to vector<8x128xf32>
    %26 = arith.mulf %25, %24 : vector<8x128xf32>
    %c0_10 = arith.constant 0 : index
    %c0_11 = arith.constant 0 : index
    %c0_12 = arith.constant 0 : index
    %27 = vector.load %arg3[%c0_10, %c0_11, %c0_12] : memref<2x8x128xf32, #tpu.memory_space<vmem>>, vector<1x8x128xf32>
    %28 = vector.shape_cast %27 : vector<1x8x128xf32> to vector<8x128xf32>
    %29 = vector.shape_cast %26 : vector<8x128xf32> to vector<1x8x128xf32>
    tpu.vector_store %arg3[%c0_10, %c0_11, %c0_12], %29 {strides = array<i32>} : memref<2x8x128xf32, #tpu.memory_space<vmem>>, vector<1x8x128xf32>,
    %c7 = arith.constant 7 : index
    %30 = memref.load %arg1[%c7] : memref<8xf32, #tpu.memory_space<smem>>
    %c1_13 = arith.constant 1 : index
    %31 = memref.load %arg1[%c1_13] : memref<8xf32, #tpu.memory_space<smem>>
    %32 = vector.broadcast %31 : f32 to vector<8x128xf32>
    %33 = arith.mulf %32, %1 : vector<8x128xf32>
    %34 = vector.broadcast %30 : f32 to vector<8x128xf32>
    %35 = arith.addf %34, %33 : vector<8x128xf32>
    %c3 = arith.constant 3 : index
    %36 = memref.load %arg1[%c3] : memref<8xf32, #tpu.memory_space<smem>>
    %37 = vector.broadcast %36 : f32 to vector<8x128xf32>
    %38 = arith.mulf %37, %3 : vector<8x128xf32>
    %39 = arith.addf %35, %38 : vector<8x128xf32>
    %c5 = arith.constant 5 : index
    %40 = memref.load %arg1[%c5] : memref<8xf32, #tpu.memory_space<smem>>
    %41 = vector.broadcast %40 : f32 to vector<8x128xf32>
    %42 = arith.mulf %41, %5 : vector<8x128xf32>
    %43 = arith.addf %39, %42 : vector<8x128xf32>
    %cst_14 = arith.constant 5.000000e-01 : f32
    %44 = vector.broadcast %cst_14 : f32 to vector<8x128xf32>
    %45 = arith.mulf %44, %43 : vector<8x128xf32>
    %46 = math.tanh %45 : vector<8x128xf32>
    %cst_15 = arith.constant 1.000000e+00 : f32
    %47 = vector.broadcast %cst_15 : f32 to vector<8x128xf32>
    %48 = arith.addf %46, %47 : vector<8x128xf32>
    %cst_16 = arith.constant 5.000000e-01 : f32
    %49 = vector.broadcast %cst_16 : f32 to vector<8x128xf32>
    %50 = arith.mulf %49, %48 : vector<8x128xf32>
    %c1_17 = arith.constant 1 : index
    %c0_18 = arith.constant 0 : index
    %c0_19 = arith.constant 0 : index
    %51 = vector.load %arg3[%c1_17, %c0_18, %c0_19] : memref<2x8x128xf32, #tpu.memory_space<vmem>>, vector<1x8x128xf32>
    %52 = vector.shape_cast %51 : vector<1x8x128xf32> to vector<8x128xf32>
    %53 = vector.shape_cast %50 : vector<8x128xf32> to vector<1x8x128xf32>
    tpu.vector_store %arg3[%c1_17, %c0_18, %c0_19], %53 {strides = array<i32>} : memref<2x8x128xf32, #tpu.memory_space<vmem>>, vector<1x8x128xf32>,
    return
  }
  func.func @transform_0(%arg0: i32) -> i32 {
    %c0_i32 = arith.constant 0 : i32
    %c0_i32_0 = arith.constant 0 : i32
    return %c0_i32 : i32
  }
  func.func @transform_1(%arg0: i32) -> (i32, i32, i32) {
    %c0_i32 = arith.constant 0 : i32
    %c0_i32_0 = arith.constant 0 : i32
    %c0_i32_1 = arith.constant 0 : i32
    return %c0_i32, %arg0, %c0_i32_0 : i32, i32, i32
  }
  func.func @transform_2(%arg0: i32) -> (i32, i32, i32) {
    %c0_i32 = arith.constant 0 : i32
    %c0_i32_0 = arith.constant 0 : i32
    %c0_i32_1 = arith.constant 0 : i32
    return %c0_i32, %arg0, %c0_i32_0 : i32, i32, i32
  }
}

</mosaic_0001>

<bundles_post_ra>
// kernel: fully_connected_forward.1
= control target key start
LH: loop header
LB: loop body
LE: loop exit
PB: predicated region body
PF: predicated region fallthrough
CT: control target
= control target key end

     0   :  { %7 = vsyncpa [#allocation3], 0  ;;  %s136_s0 = inlined_call_operand.vmem [shape: f32[8], index: 0, kind: input, shape index: {}]   ;;  %s137_s1 = inlined_call_operand.vmem [shape: f32[3,8,128], index: 1, kind: input, shape index: {}]   ;;  %s138_s2 = inlined_call_operand.vmem [shape: f32[2,8,128], index: 2, kind: output, shape index: {}]  }
   0x1   :  { %s14_s11 = sshll.u32 %s136_s0, 4  ;;  %s15_s11 = int_to_ptr.vmem [resolvable:$true] %s14_s11 }
   0x2   :  { %s88_s12 = scalar_lea.vmem %s15_s11, 16  ;;  %p93_p1 = scmp.lt.s32.totalorder %s15_s11, %s15_s11 }
   0x3   :  { %p89_p0 = scmp.ne.s32.totalorder %s15_s11, %s88_s12  ;;  %p94_p2 = scmp.lt.s32.totalorder %s88_s12, %s88_s12 }
   0x5   :  { %p95_p3 = por %p94_p2, %p93_p1 }
   0x7   :  { %p96_p4 = pnand %p95_p3, %p89_p0 }
   0x9   :  { %99 = shalt.err (!%p96_p4)
}
   0xa   :  { %s102_s13 = smov [#allocation2]  }
   0xb   :  { %17 = dma.vmem_to_smem %s15_s11, 16, %s102_s13, [#allocation3]  }
   0xc   :  { %100 = dma.done.wait [#allocation3], 16  }
   0xd   :  { %101 = vsyncadd [#allocation3], 4294967280 }
   0xe   :  { %23 = sfence }
   0xf   :  { %s75_s14 = sld [smem:[#allocation2 + $0x6]]  ;;  %s30_s15 = sld [smem:[#allocation2]]  ;;  %v24_v0 = vld [vmem:[%s137_s1] sm:$0xff]  ;;  %v73_v1 = vld [vmem:[%s137_s1 + $0x8] sm:$0xff]  ;;  %v74_v2 = vld [vmem:[%s137_s1 + $0x10] sm:$0xff] }
  0x10   :  { %s76_s16 = sld [smem:[#allocation2 + $0x2]]  ;;  %s77_s17 = sld [smem:[#allocation2 + $0x4]] }
  0x11   :  { %s78_s18 = sld [smem:[#allocation2 + $0x7]]  ;;  %s79_s19 = sld [smem:[#allocation2 + $0x1]] }
  0x12   :  { %s80_s0 = sld [smem:[#allocation2 + $0x3]]  ;;  %s81_s20 = sld [smem:[#allocation2 + $0x5]] }
  0x15   :  { %v31_v3 = vstv %s30_s15  ;;  %v33_v4 = vstv %s75_s14 }
  0x16   :  { %v36_v5 = vstv %s76_s16  ;;  %v32_v6 = vmul.f32 %v31_v3, %v24_v0  ;;  %v40_v8 = vstv %s77_s17 }
  0x17   :  { %v37_v7 = vmul.f32 %v73_v1, %v36_v5  ;;  %v41_v9 = vmul.f32 %v74_v2, %v40_v8  ;;  %v50_v10 = vstv %s79_s19  ;;  %v52_v11 = vstv %s78_s18 }
  0x18   :  { %v55_v12 = vstv %s80_s0  ;;  %v34_v13 = vadd.f32 %v33_v4, %v32_v6  ;;  %v51_v14 = vmul.f32 %v50_v10, %v24_v0  ;;  %v59_v16 = vstv %s81_s20 }
  0x19   :  { %v56_v15 = vmul.f32 %v73_v1, %v55_v12  ;;  %v60_v19 = vmul.f32 %v74_v2, %v59_v16 }
  0x1a   :  { %v38_v17 = vadd.f32 %v37_v7, %v34_v13  ;;  %v53_v18 = vadd.f32 %v52_v11, %v51_v14 }
  0x1c   :  { %v42_v20 = vadd.f32 %v41_v9, %v38_v17  ;;  %v57_v21 = vadd.f32 %v56_v15, %v53_v18 }
  0x1e   :  { %v43_v22 = vmul.f32 0.5, %v42_v20  ;;  %v61_v23 = vadd.f32 %v60_v19, %v57_v21 }
  0x20   :  { %84 = vtanh.f32 %v43_v22  ;;  %v62_v24 = vmul.f32 0.5, %v61_v23 }
  0x22   :  { %86 = vtanh.f32 %v62_v24 }
  0x2a   :  { %v85_v25 = vpop.eup %84 }
  0x2b   :  { %v45_v26 = vadd.f32 1.0, %v85_v25 }
  0x2c   :  { %v87_v27 = vpop.eup %86 }
  0x2d   :  { %v46_v28 = vmul.f32 0.5, %v45_v26  ;;  %v64_v29 = vadd.f32 1.0, %v87_v27 }
  0x2f   :  { %47 = vst [vmem:[%s138_s2] sm:$0xff] %v46_v28  ;;  %v65_v30 = vmul.f32 0.5, %v64_v29 }
  0x31   :  { %82 = vst [vmem:[%s138_s2 + $0x8] sm:$0xff] %v65_v30 }
  0x32   :  { %72 = vsyncpa [#allocation3], 1 }

</bundles_post_ra>
